<compile_context>
chip_gen: v6e
topology: v6e:2x2x1
jax: 0.10.0
libtpu: 0.0.40
codegen_flags: <defaults>
</compile_context>

<pallas_src>
import functools
import math

import jax
import jax.numpy as jnp
from jax.experimental import pallas as pl
from jax.experimental.pallas import tpu as pltpu

_INV_SQRT2 = 1.0 / math.sqrt(2.0)  # Python float -> safe inside kernel closures


def _erf(x):
    # Abramowitz & Stegun 7.1.26 rational approximation (|err| <= 1.5e-7).
    # mul/add/exp/select only (always lowers in Mosaic); the divide goes to the EUP
    # via approx reciprocal (epilogue VALU relief, error ~2^-12 -> negligible here).
    a1, a2, a3, a4, a5 = (0.254829592, -0.284496736, 1.421413741,
                          -1.453152027, 1.061405429)
    p = 0.3275911
    z = jnp.abs(x)
    t = pl.reciprocal(1.0 + p * z, approx=True)
    poly = ((((a5 * t + a4) * t + a3) * t + a2) * t + a1) * t
    y = 1.0 - poly * jnp.exp(-z * z)
    return jnp.where(x < 0.0, -y, y)


def _gelu(x):
    # exact (erf-based) GELU, matching torch nn.GELU() default
    return 0.5 * x * (1.0 + _erf(x * _INV_SQRT2))


def _round_up(v, m):
    return (v + m - 1) // m * m


def _pick_tile(dim, block, align):
    """Largest `align`-multiple tile <= block; prefer one dividing `dim` exactly
    (so no padding / no output slice), as long as it stays reasonably large."""
    block = _round_up(max(block, align), align)
    cap = min(block, _round_up(dim, align))
    if dim % align == 0:
        t = cap
        while t >= align:
            if dim % t == 0 and t >= min(cap, 256):
                return t
            t -= align
    return cap


# ----------------------------------------------------------------------------
# Kernel: tiled matmul with f32 VMEM accumulator + fused bias / GELU epilogue
# ----------------------------------------------------------------------------
def _fc_kernel(x_ref, w_ref, b_ref, o_ref, acc_ref, *, use_gelu):
    k = pl.program_id(2)

    @pl.when(k == 0)
    def _():
        acc_ref[...] = jnp.zeros_like(acc_ref)

    # If the wrapper left x in its original dtype (single-N-tile path), cast the
    # block to the weight compute dtype here (no-op astype otherwise).
    acc_ref[...] += jnp.dot(x_ref[...].astype(w_ref.dtype), w_ref[...],
                            preferred_element_type=jnp.float32)

    @pl.when(k == pl.num_programs(2) - 1)
    def _():
        y = acc_ref[...] + b_ref[...]
        if use_gelu:
            y = _gelu(y)
        o_ref[...] = y.astype(o_ref.dtype)   # write output directly in x.dtype


# ----------------------------------------------------------------------------
# One-time parameter prep (call at init, reuse across forwards): cast + pad the
# weight / bias so every forward avoids a weight-sized HBM round trip.
#   w : (in_size, out_size)  == torch weight.T       b : (out_size,)
# ----------------------------------------------------------------------------
def prepare_fc_params(w, b, *, block_n=512, block_k=1024,
                      compute_dtype=jnp.bfloat16):
    K, N = w.shape
    TN = _pick_tile(N, block_n, 128)
    TK = _pick_tile(K, block_k, 128)
    Kp, Np = _round_up(K, TK), _round_up(N, TN)
    wd = w.astype(compute_dtype) if compute_dtype is not None else w
    if (Kp, Np) != (K, N):
        wd = jnp.pad(wd, ((0, Kp - K), (0, Np - N)))
    b2 = b.reshape(1, N).astype(jnp.float32)
    if Np != N:
        b2 = jnp.pad(b2, ((0, 0), (0, Np - N)))
    return wd, b2


# ----------------------------------------------------------------------------
# Wrapper: FC.forward(x) == GELU(x @ W^T + b)  (dropout = identity in eval)
#   x : (..., in_size)
#   w : (in_size, out_size)  (raw)  OR pre-prepared (Kp, Np) from prepare_fc_params
#   b : (out_size,)          (raw)  OR pre-prepared (1, Np)
#   out_size : true out_size when passing pre-padded params (defaults to w.shape[1])
# ----------------------------------------------------------------------------
def fc_forward(x, w, b, *, use_gelu=True, pdrop=0.0, out_size=None,
               block_m=512, block_n=512, block_k=1024,
               compute_dtype=jnp.bfloat16):
    del pdrop  # TODO(synk): dropout is a train-time op; identity in eval mode.

    orig_shape = x.shape
    K_x = orig_shape[-1]
    K_w, N_w = w.shape
    if out_size is None:
        out_size = N_w
    M = int(math.prod(orig_shape[:-1]))
    x2 = x.reshape(M, K_x)

    # Tile sizes: sublane-/lane-aligned, capped by the (padded) problem size.
    TM = _pick_tile(M, block_m, 8)
    TN = _pick_tile(N_w, block_n, 128)
    TK = _pick_tile(K_w, block_k, 128)
    Mp, Np, Kp = _round_up(M, TM), _round_up(N_w, TN), _round_up(K_w, TK)
    n_j_tiles = Np // TN

    # Weights / bias: no-ops when already prepared via prepare_fc_params.
    wd = w
    if compute_dtype is not None and wd.dtype != compute_dtype:
        wd = wd.astype(compute_dtype)
    if (Kp, Np) != (K_w, N_w):
        wd = jnp.pad(wd, ((0, Kp - K_w), (0, Np - N_w)))
    b2 = b.reshape(1, -1).astype(jnp.float32)
    if b2.shape[1] != Np:
        b2 = jnp.pad(b2, ((0, 0), (0, Np - b2.shape[1])))

    # Activations: only pre-cast when they will be re-streamed per N tile;
    # otherwise stream once in native dtype and cast in-kernel.
    xd = x2
    if compute_dtype is not None and xd.dtype != compute_dtype and n_j_tiles > 1:
        xd = xd.astype(compute_dtype)
    if (Mp, Kp) != (M, K_x):
        xd = jnp.pad(xd, ((0, Mp - M), (0, Kp - K_x)))

    grid = (Mp // TM, Np // TN, Kp // TK)
    kernel = functools.partial(_fc_kernel, use_gelu=use_gelu)

    out_dtype = x.dtype
    itemsize = jnp.dtype(out_dtype).itemsize
    cost = pl.CostEstimate(
        flops=2 * M * out_size * K_x,
        transcendentals=(M * out_size) if use_gelu else 0,
        bytes_accessed=(x2.size * x2.dtype.itemsize
                        + wd.size * wd.dtype.itemsize
                        + b2.size * 4
                        + M * out_size * itemsize),
    )

    out = pl.pallas_call(
        kernel,
        out_shape=jax.ShapeDtypeStruct((Mp, Np), out_dtype),
        grid_spec=pltpu.PrefetchScalarGridSpec(
            num_scalar_prefetch=0,
            grid=grid,
            in_specs=[
                pl.BlockSpec((TM, TK), lambda i, j, k: (i, k)),   # activations
                pl.BlockSpec((TK, TN), lambda i, j, k: (k, j)),   # weights
                pl.BlockSpec((1, TN), lambda i, j, k: (0, j)),    # bias (lane-dense)
            ],
            out_specs=pl.BlockSpec((TM, TN), lambda i, j, k: (i, j)),
            scratch_shapes=[pltpu.VMEM((TM, TN), jnp.float32)],
        ),
        compiler_params=pltpu.CompilerParams(
            dimension_semantics=("parallel", "parallel", "arbitrary")),
        cost_estimate=cost,
    )(xd, wd, b2)

    if (Mp, Np) != (M, out_size):
        out = out[:M, :out_size]
    return out.reshape(*orig_shape[:-1], out_size)


# ----------------------------------------------------------------------------
# Pure-JAX reference (exact torch semantics, f32 end-to-end)
# ----------------------------------------------------------------------------
def _fc_ref(x, w, b, *, use_gelu=True):
    y = x @ w + b
    if use_gelu:
        y = jax.nn.gelu(y, approximate=False)
    return y


if __name__ == "__main__":
    # Small shapes consistent with the module: sequence features (B, S, in_size)
    B, S, IN_SIZE, OUT_SIZE = 2, 8, 32, 64

    root = jax.random.PRNGKey(0)
    kx, kw, kb = jax.random.split(root, 3)
    x = jax.random.normal(kx, (B, S, IN_SIZE), jnp.float32)
    # torch nn.Linear stores weight as (out, in); we keep its transpose (in, out).
    w = 0.1 * jax.random.normal(kw, (IN_SIZE, OUT_SIZE), jnp.float32)
    b = 0.1 * jax.random.normal(kb, (OUT_SIZE,), jnp.float32)

    ref = _fc_ref(x, w, b, use_gelu=True)

    # Recommended usage: prepare (cast + pad) the weights once, reuse every forward.
    w_prep, b_prep = prepare_fc_params(w, b)
    fwd = jax.jit(functools.partial(fc_forward, use_gelu=True, pdrop=0.1,
                                    out_size=OUT_SIZE))
    out = jax.block_until_ready(fwd(x, w_prep, b_prep))
    assert out.shape == (B, S, OUT_SIZE), out.shape
    # bf16 MXU inputs (f32 accumulation) -> loose-ish tolerance vs f32 reference
    err = float(jnp.max(jnp.abs(out - ref)))
    assert jnp.allclose(out, ref, atol=3e-2, rtol=3e-2), err

    # Raw-weight path (cast/pad inside the wrapper) must give the same result.
    out_raw = jax.block_until_ready(
        jax.jit(functools.partial(fc_forward, use_gelu=True, pdrop=0.1))(x, w, b))
    assert out_raw.shape == (B, S, OUT_SIZE), out_raw.shape
    err_raw = float(jnp.max(jnp.abs(out_raw - ref)))
    assert jnp.allclose(out_raw, ref, atol=3e-2, rtol=3e-2), err_raw

    print("KERNEL_OK")
</pallas_src>

<mosaic_0001>
module attributes {stable_mosaic.version = 11 : i64} {
  func.func @_fc_kernel(%arg0: i32, %arg1: i32, %arg2: i32, %arg3: memref<16x128xf32, #tpu.memory_space<vmem>>, %arg4: memref<128x128xbf16, #tpu.memory_space<vmem>>, %arg5: memref<1x128xf32, #tpu.memory_space<vmem>>, %arg6: memref<16x128xf32, #tpu.memory_space<vmem>>, %arg7: memref<16x128xf32, #tpu.memory_space<vmem>>) attributes {dimension_semantics = [#tpu.dimension_semantics<parallel>, #tpu.dimension_semantics<parallel>, #tpu.dimension_semantics<arbitrary>], iteration_bounds = array<i64: 1, 1, 1>, scalar_prefetch = 0 : i64, scratch_operands = 1 : i64, tpu.core_type = #tpu.core_type<tc>, window_params = [{transform_indices = @transform_0, window_bounds = array<i64: 16, 128>}, {transform_indices = @transform_1, window_bounds = array<i64: 128, 128>}, {transform_indices = @transform_2, window_bounds = array<i64: 1, 128>}, {transform_indices = @transform_3, window_bounds = array<i64: 16, 128>}]} {
    %c0_i32 = arith.constant 0 : i32
    %0 = arith.cmpi eq, %arg2, %c0_i32 : i32
    %1 = arith.extui %0 : i1 to i32
    %c0_i32_0 = arith.constant 0 : i32
    %2 = arith.cmpi ne, %1, %c0_i32_0 : i32
    scf.if %2 {
      %cst_10 = arith.constant 0.000000e+00 : f32
      %13 = vector.broadcast %cst_10 : f32 to vector<16x128xf32>
      %c0_11 = arith.constant 0 : index
      %c0_12 = arith.constant 0 : index
      %14 = vector.load %arg7[%c0_11, %c0_12] : memref<16x128xf32, #tpu.memory_space<vmem>>, vector<16x128xf32>
      tpu.vector_store %arg7[%c0_11, %c0_12], %13 {strides = array<i32>} : memref<16x128xf32, #tpu.memory_space<vmem>>, vector<16x128xf32>,
    } else {
    }
    %c0 = arith.constant 0 : index
    %c0_1 = arith.constant 0 : index
    %3 = vector.load %arg7[%c0, %c0_1] : memref<16x128xf32, #tpu.memory_space<vmem>>, vector<16x128xf32>
    %c0_2 = arith.constant 0 : index
    %c0_3 = arith.constant 0 : index
    %4 = vector.load %arg3[%c0_2, %c0_3] : memref<16x128xf32, #tpu.memory_space<vmem>>, vector<16x128xf32>
    %5 = arith.truncf %4 : vector<16x128xf32> to vector<16x128xbf16>
    %c0_4 = arith.constant 0 : index
    %c0_5 = arith.constant 0 : index
    %6 = vector.load %arg4[%c0_4, %c0_5] : memref<128x128xbf16, #tpu.memory_space<vmem>>, vector<128x128xbf16>
    %cst = arith.constant dense<0.000000e+00> : vector<16x128xf32>
    %7 = tpu.matmul %5, %6, %cst {dimension_numbers = #tpu.dot_dimension_numbers<[1], [0], [0], [1], [0, 0, 1, 1], [], []>} : vector<16x128xbf16>, vector<128x128xbf16>, vector<16x128xf32> -> vector<16x128xf32>
    %8 = arith.addf %3, %7 : vector<16x128xf32>
    %c0_6 = arith.constant 0 : index
    %c0_7 = arith.constant 0 : index
    %9 = vector.load %arg7[%c0_6, %c0_7] : memref<16x128xf32, #tpu.memory_space<vmem>>, vector<16x128xf32>
    tpu.vector_store %arg7[%c0_6, %c0_7], %8 {strides = array<i32>} : memref<16x128xf32, #tpu.memory_space<vmem>>, vector<16x128xf32>,
    %c0_i32_8 = arith.constant 0 : i32
    %10 = arith.cmpi eq, %arg2, %c0_i32_8 : i32
    %11 = arith.extui %10 : i1 to i32
    %c0_i32_9 = arith.constant 0 : i32
    %12 = arith.cmpi ne, %11, %c0_i32_9 : i32
    scf.if %12 {
      %c0_10 = arith.constant 0 : index
      %c0_11 = arith.constant 0 : index
      %13 = vector.load %arg7[%c0_10, %c0_11] : memref<16x128xf32, #tpu.memory_space<vmem>>, vector<16x128xf32>
      %c0_12 = arith.constant 0 : index
      %c0_13 = arith.constant 0 : index
      %14 = vector.load %arg5[%c0_12, %c0_13] : memref<1x128xf32, #tpu.memory_space<vmem>>, vector<1x128xf32>
      %15 = vector.broadcast %14 : vector<1x128xf32> to vector<16x128xf32>
      %16 = arith.addf %13, %15 : vector<16x128xf32>
      %cst_14 = arith.constant 5.000000e-01 : f32
      %17 = vector.broadcast %cst_14 : f32 to vector<16x128xf32>
      %18 = arith.mulf %17, %16 : vector<16x128xf32>
      %cst_15 = arith.constant 0.707106769 : f32
      %19 = vector.broadcast %cst_15 : f32 to vector<16x128xf32>
      %20 = arith.mulf %16, %19 : vector<16x128xf32>
      %21 = math.absf %20 : vector<16x128xf32>
      %cst_16 = arith.constant 0.327591091 : f32
      %22 = vector.broadcast %cst_16 : f32 to vector<16x128xf32>
      %23 = arith.mulf %22, %21 : vector<16x128xf32>
      %cst_17 = arith.constant 1.000000e+00 : f32
      %24 = vector.broadcast %cst_17 : f32 to vector<16x128xf32>
      %25 = arith.addf %24, %23 : vector<16x128xf32>
      %26 = tpu.reciprocal %25 {approx = true} : vector<16x128xf32> -> vector<16x128xf32>
      %cst_18 = arith.constant 1.06140542 : f32
      %27 = vector.broadcast %cst_18 : f32 to vector<16x128xf32>
      %28 = arith.mulf %27, %26 : vector<16x128xf32>
      %cst_19 = arith.constant -1.45315206 : f32
      %29 = vector.broadcast %cst_19 : f32 to vector<16x128xf32>
      %30 = arith.addf %28, %29 : vector<16x128xf32>
      %31 = arith.mulf %30, %26 : vector<16x128xf32>
      %cst_20 = arith.constant 1.42141378 : f32
      %32 = vector.broadcast %cst_20 : f32 to vector<16x128xf32>
      %33 = arith.addf %31, %32 : vector<16x128xf32>
      %34 = arith.mulf %33, %26 : vector<16x128xf32>
      %cst_21 = arith.constant -0.284496725 : f32
      %35 = vector.broadcast %cst_21 : f32 to vector<16x128xf32>
      %36 = arith.addf %34, %35 : vector<16x128xf32>
      %37 = arith.mulf %36, %26 : vector<16x128xf32>
      %cst_22 = arith.constant 0.254829586 : f32
      %38 = vector.broadcast %cst_22 : f32 to vector<16x128xf32>
      %39 = arith.addf %37, %38 : vector<16x128xf32>
      %40 = arith.mulf %39, %26 : vector<16x128xf32>
      %cst_23 = arith.constant 0.000000e+00 : f32
      %41 = vector.broadcast %cst_23 : f32 to vector<16x128xf32>
      %42 = arith.subf %41, %21 : vector<16x128xf32>
      %43 = arith.mulf %42, %21 : vector<16x128xf32>
      %44 = math.exp %43 : vector<16x128xf32>
      %45 = arith.mulf %40, %44 : vector<16x128xf32>
      %cst_24 = arith.constant 1.000000e+00 : f32
      %46 = vector.broadcast %cst_24 : f32 to vector<16x128xf32>
      %47 = arith.subf %46, %45 : vector<16x128xf32>
      %cst_25 = arith.constant 0.000000e+00 : f32
      %48 = vector.broadcast %cst_25 : f32 to vector<16x128xf32>
      %49 = arith.cmpf olt, %20, %48 : vector<16x128xf32>
      %cst_26 = arith.constant 0.000000e+00 : f32
      %50 = vector.broadcast %cst_26 : f32 to vector<16x128xf32>
      %51 = arith.subf %50, %47 : vector<16x128xf32>
      %52 = arith.select %49, %51, %47 : vector<16x128xi1>, vector<16x128xf32>
      %cst_27 = arith.constant 1.000000e+00 : f32
      %53 = vector.broadcast %cst_27 : f32 to vector<16x128xf32>
      %54 = arith.addf %53, %52 : vector<16x128xf32>
      %55 = arith.mulf %18, %54 : vector<16x128xf32>
      %c0_28 = arith.constant 0 : index
      %c0_29 = arith.constant 0 : index
      %56 = vector.load %arg6[%c0_28, %c0_29] : memref<16x128xf32, #tpu.memory_space<vmem>>, vector<16x128xf32>
      tpu.vector_store %arg6[%c0_28, %c0_29], %55 {strides = array<i32>} : memref<16x128xf32, #tpu.memory_space<vmem>>, vector<16x128xf32>,
    } else {
    }
    return
  }
  func.func @transform_0(%arg0: i32, %arg1: i32, %arg2: i32) -> (i32, i32) {
    %c0_i32 = arith.constant 0 : i32
    return %arg0, %arg2 : i32, i32
  }
  func.func @transform_1(%arg0: i32, %arg1: i32, %arg2: i32) -> (i32, i32) {
    %c0_i32 = arith.constant 0 : i32
    return %arg2, %arg1 : i32, i32
  }
  func.func @transform_2(%arg0: i32, %arg1: i32, %arg2: i32) -> (i32, i32) {
    %c0_i32 = arith.constant 0 : i32
    %c0_i32_0 = arith.constant 0 : i32
    return %c0_i32, %arg1 : i32, i32
  }
  func.func @transform_3(%arg0: i32, %arg1: i32, %arg2: i32) -> (i32, i32) {
    %c0_i32 = arith.constant 0 : i32
    return %arg0, %arg1 : i32, i32
  }
}

</mosaic_0001>

<bundles_post_ra>
// kernel: fc_forward.1
= control target key start
LH: loop header
LB: loop body
LE: loop exit
PB: predicated region body
PF: predicated region fallthrough
CT: control target
= control target key end

     0   :  { %8 = vsyncpa [#allocation4], 0  ;;  %s303_s12 = smov [#allocation3]   ;;  %s346_s0 = inlined_call_operand.vmem [shape: f32[16,128], index: 0, kind: input, shape index: {}]   ;;  %s347_s1 = inlined_call_operand.hbm [shape: bf16[128,128], index: 1, kind: input, shape index: {}]   ;;  %s348_s2 = inlined_call_operand.vmem [shape: f32[1,128], index: 2, kind: input, shape index: {}]   ;;  %s349_s3 = inlined_call_operand.vmem [shape: f32[16,128], index: 3, kind: output, shape index: {}]  }
   0x1   :  { %s16_s13 = sshll.u32 %s303_s12, 4  ;;  %s17_s13 = int_to_ptr.vmem [resolvable:$true] %s16_s13 }
   0x2   :  { %s289_s14 = scalar_lea.vmem %s17_s13, 1024  ;;  %p294_p1 = scmp.lt.s32.totalorder %s17_s13, %s17_s13 }
   0x3   :  { %p290_p0 = scmp.ne.s32.totalorder %s17_s13, %s289_s14  ;;  %p295_p2 = scmp.lt.s32.totalorder %s289_s14, %s289_s14 }
   0x5   :  { %p296_p3 = por %p295_p2, %p294_p1 }
   0x7   :  { %p297_p4 = pnand %p296_p3, %p290_p0 }
   0x9   :  { %300 = shalt.err (!%p297_p4)
}
   0xa   :  { %s304_s15 = smov 64   ;;  %s305_s16 = smov 4  }
   0xb   :  { %22 = dma.hbm_to_vmem [thread:$0]  %s347_s1, 1024, %s17_s13, [#allocation4], %s304_s15, %s304_s15, %s305_s16  }
   0xc   :  { %301 = dma.done.wait [#allocation4], 1024  }
   0xd   :  { %302 = vsyncadd [#allocation4], 4294966272  ;;  %v306_v0 = vmov 0.0   ;;  %vm307_vm0 = vmmov 0   ;;  %v265_v1 = vld [vmem:[#allocation3 + $0x38] sm:$0xff]   ;;  %v266_v2 = vld [vmem:[#allocation3 + $0x30] sm:$0xff]  }
   0xe   :  { %240 = vmatprep.subr.bf16.mxu0 %v306_v0  ;;  %256 = vmatprep.mubr.msk.bf16.mxu0 %vm307_vm0, %v306_v0  ;;  %v267_v3 = vld [vmem:[#allocation3 + $0x28] sm:$0xff]   ;;  %v268_v4 = vld [vmem:[#allocation3 + $0x20] sm:$0xff]   ;;  %v269_v5 = vld [vmem:[#allocation3 + $0x18] sm:$0xff]  }
   0xf   :  { %241 = vmatpush3.bf16.msra.mxu0 %v265_v1  ;;  %v270_v6 = vld [vmem:[#allocation3 + $0x10] sm:$0xff]   ;;  %v271_v7 = vld [vmem:[#allocation3 + $0x8] sm:$0xff]   ;;  %v272_v8 = vld [vmem:[#allocation3] sm:$0xff]  }
  0x10   :  { %242 = vmatprep.subr.bf16.mxu0 %v306_v0  ;;  %v37_v9 = vld [vmem:[%s346_s0] sm:$0xff]  ;;  %v38_v10 = vld [vmem:[%s346_s0 + $0x8] sm:$0xff] }
  0x11   :  { %v39_v11 = vpack.c.bf16 %v38_v10, %v37_v9  ;;  %v230_v12 = vld [vmem:[%s348_s2] ss:$0 sm:$0xff] }
  0x13   :  { %243 = vmatpush3.bf16.msra.mxu0 %v266_v2 }
  0x14   :  { %244 = vmatprep.subr.bf16.mxu0 %v306_v0 }
  0x17   :  { %245 = vmatpush3.bf16.msra.mxu0 %v267_v3 }
  0x18   :  { %246 = vmatprep.subr.bf16.mxu0 %v306_v0 }
  0x1b   :  { %247 = vmatpush3.bf16.msra.mxu0 %v268_v4 }
  0x1c   :  { %248 = vmatprep.subr.bf16.mxu0 %v306_v0 }
  0x1f   :  { %249 = vmatpush3.bf16.msra.mxu0 %v269_v5 }
  0x20   :  { %250 = vmatprep.subr.bf16.mxu0 %v306_v0 }
  0x23   :  { %251 = vmatpush3.bf16.msra.mxu0 %v270_v6 }
  0x24   :  { %252 = vmatprep.subr.bf16.mxu0 %v306_v0 }
  0x27   :  { %253 = vmatpush3.bf16.msra.mxu0 %v271_v7 }
  0x28   :  { %254 = vmatprep.subr.bf16.mxu0 %v306_v0 }
  0x2b   :  { %255 = vmatpush3.bf16.msra.mxu0 %v272_v8 }
  0x2e   :  { %257 = vmatmul.mubr.bf16.vlgmr.msra.gmra.mxu0 %v39_v11 }
  0xee   :  { %v138_v13 = vpop.f32.mrf.mxu0 }
  0xef   :  { %v161_v14 = vadd.f32 %v230_v12, %v138_v13 }
  0xf0   :  { %v258_v15 = vpop.f32.mrf.mxu0 }
  0xf1   :  { %v165_v16 = vmul.f32 0.70710677, %v161_v14  ;;  %v163_v61 = vmul.f32 0.5, %v161_v14 }
  0xf2   :  { %v141_v17 = vpop.f32.mrf.mxu0 }
  0xf3   :  { %v167_v18 = vand.u32 2147483647, %v165_v16  ;;  %v162_v19 = vadd.f32 %v230_v12, %v141_v17  ;;  %vm205_vm1 = vcmp.lt.f32.partialorder %v165_v16, 0.0 }
  0xf4   :  { %v259_v20 = vpop.f32.mrf.mxu0 }
  0xf5   :  { %v169_v21 = vmul.f32 0.3275911, %v167_v18  ;;  %v166_v22 = vmul.f32 0.70710677, %v162_v19  ;;  %v193_v27 = vsub.f32 0.0, %v167_v18  ;;  %v164_v2 = vmul.f32 0.5, %v162_v19 }
  0xf7   :  { %v171_v23 = vadd.f32 1.0, %v169_v21  ;;  %v168_v24 = vand.u32 2147483647, %v166_v22  ;;  %v195_v28 = vmul.f32 %v193_v27, %v167_v18  ;;  %vm206_vm2 = vcmp.lt.f32.partialorder %v166_v22, 0.0 }
  0xf9   :  { %273 = vrcp.f32 %v171_v23  ;;  %v170_v25 = vmul.f32 0.3275911, %v168_v24  ;;  %v194_v29 = vsub.f32 0.0, %v168_v24  ;;  %v197_v32 = vmul.f32 1.442695, %v195_v28 }
  0xfb   :  { %v172_v26 = vadd.f32 1.0, %v170_v25  ;;  %v196_v33 = vmul.f32 %v194_v29, %v168_v24 }
  0xfd   :  { %275 = vrcp.f32 %v172_v26  ;;  %v199_v38 = vmul.f32 1.442695, %v196_v33 }
  0xfe   :  { %277 = vpow2.f32 %v197_v32 }
  0xff   :  { %279 = vpow2.f32 %v199_v38 }
 0x106   :  { %v274_v30 = vpop.eup %273 }
 0x107   :  { %v175_v31 = vmul.f32 1.0614054, %v274_v30 }
 0x109   :  { %v177_v34 = vadd.f32 -1.4531521, %v175_v31 }
 0x10a   :  { %v276_v35 = vpop.eup %275 }
 0x10b   :  { %v179_v36 = vmul.f32 %v274_v30, %v177_v34  ;;  %v176_v37 = vmul.f32 1.0614054, %v276_v35  ;;  %v278_v51 = vpop.eup %277 }
 0x10c   :  { %v280_v56 = vpop.eup %279 }
 0x10d   :  { %v181_v39 = vadd.f32 1.4214138, %v179_v36  ;;  %v178_v40 = vadd.f32 -1.4531521, %v176_v37 }
 0x10f   :  { %v183_v41 = vmul.f32 %v274_v30, %v181_v39  ;;  %v180_v42 = vmul.f32 %v276_v35, %v178_v40 }
 0x111   :  { %v185_v43 = vadd.f32 -0.28449672, %v183_v41  ;;  %v182_v44 = vadd.f32 1.4214138, %v180_v42 }
 0x113   :  { %v187_v45 = vmul.f32 %v274_v30, %v185_v43  ;;  %v184_v46 = vmul.f32 %v276_v35, %v182_v44 }
 0x115   :  { %v189_v47 = vadd.f32 0.2548296, %v187_v45  ;;  %v186_v48 = vadd.f32 -0.28449672, %v184_v46 }
 0x117   :  { %v191_v49 = vmul.f32 %v274_v30, %v189_v47  ;;  %v188_v50 = vmul.f32 %v276_v35, %v186_v48 }
 0x119   :  { %v201_v52 = vmul.f32 %v278_v51, %v191_v49  ;;  %v190_v53 = vadd.f32 0.2548296, %v188_v50 }
 0x11b   :  { %v203_v54 = vsub.f32 1.0, %v201_v52  ;;  %v192_v55 = vmul.f32 %v276_v35, %v190_v53 }
 0x11d   :  { %v207_v57 = vsub.f32 0.0, %v203_v54  ;;  %v202_v58 = vmul.f32 %v280_v56, %v192_v55 }
 0x11f   :  { %v209_v59 = vsel %vm205_vm1, %v207_v57, %v203_v54  ;;  %v204_v60 = vsub.f32 1.0, %v202_v58 }
 0x120   :  { %v211_v62 = vadd.f32 1.0, %v209_v59 }
 0x121   :  { %v208_v63 = vsub.f32 0.0, %v204_v60 }
 0x122   :  { %v213_v0 = vmul.f32 %v211_v62, %v163_v61 }
 0x123   :  { %v210_v1 = vsel %vm206_vm2, %v208_v63, %v204_v60 }
 0x124   :  { %215 = vst [vmem:[%s349_s3] sm:$0xff] %v213_v0  ;;  %v212_v3 = vadd.f32 1.0, %v210_v1 }
 0x126   :  { %v214_v4 = vmul.f32 %v212_v3, %v164_v2 }
 0x128   :  { %216 = vst [vmem:[%s349_s3 + $0x8] sm:$0xff] %v214_v4 }
 0x129   :  { %221 = vsyncpa [#allocation4], 1 }

</bundles_post_ra>
